<compile_context>
chip_gen: v6e
topology: v6e:2x2x1
jax: 0.10.0
libtpu: 0.0.40
codegen_flags: <defaults>
</compile_context>

<pallas_src>
import math
from functools import partial

import jax
import jax.numpy as jnp
from jax.experimental import pallas as pl
from jax.experimental.pallas import tpu as pltpu


def _round_up(x, m):
    return ((x + m - 1) // m) * m


# ---------------------------------------------------------------------------
# Tiled linear:  y = x @ w_t + bias     (w_t already transposed to (K, N))
# ---------------------------------------------------------------------------
def _linear_kernel(x_ref, w_ref, b_ref, o_ref, acc_ref):
    @pl.when(pl.program_id(2) == 0)
    def _init():
        acc_ref[...] = jnp.zeros_like(acc_ref)

    acc_ref[...] += jnp.dot(x_ref[...], w_ref[...],
                            preferred_element_type=jnp.float32)

    @pl.when(pl.program_id(2) == pl.num_programs(2) - 1)
    def _store():
        o_ref[...] = (acc_ref[...] + b_ref[...].astype(jnp.float32)
                      ).astype(o_ref.dtype)


def linear(x2d, w_t, bias2d, *, tm=256, tn=256, tk=512):
    """y = x2d @ w_t + bias2d.  x2d: (M, K), w_t: (K, N), bias2d: (1, N).

    Tiles are capped at the array extents for small problems (full-dim blocks
    are always layout-legal); large problems get (tm, tn, tk) tiles that fit
    comfortably inside the default scoped VMEM on v5e/v6e/v7x with
    double-buffering (~3 MiB total at f32)."""
    M, K = x2d.shape
    N = w_t.shape[1]

    bm = M if M <= tm else tm
    bn = N if N <= tn else tn
    bk = K if K <= tk else tk

    Mp, Kp, Np = _round_up(M, bm), _round_up(K, bk), _round_up(N, bn)
    if (Mp, Kp) != (M, K):
        x2d = jnp.pad(x2d, ((0, Mp - M), (0, Kp - K)))
    if (Kp, Np) != (K, N):
        w_t = jnp.pad(w_t, ((0, Kp - K), (0, Np - N)))
    if Np != N:
        bias2d = jnp.pad(bias2d, ((0, 0), (0, Np - N)))

    out = pl.pallas_call(
        _linear_kernel,
        out_shape=jax.ShapeDtypeStruct((Mp, Np), x2d.dtype),
        grid_spec=pltpu.PrefetchScalarGridSpec(
            num_scalar_prefetch=0,
            grid=(Mp // bm, Np // bn, Kp // bk),
            in_specs=[
                pl.BlockSpec((bm, bk), lambda i, j, k: (i, k)),
                pl.BlockSpec((bk, bn), lambda i, j, k: (k, j)),
                pl.BlockSpec((1, bn), lambda i, j, k: (0, j)),
            ],
            out_specs=pl.BlockSpec((bm, bn), lambda i, j, k: (i, j)),
            scratch_shapes=[pltpu.VMEM((bm, bn), jnp.float32)],
        ),
        compiler_params=pltpu.CompilerParams(
            dimension_semantics=("parallel", "parallel", "arbitrary")),
    )(x2d, w_t, bias2d)

    if (Mp, Np) != (M, N):
        out = out[:M, :N]
    return out


# ---------------------------------------------------------------------------
# Fused multi-head SDPA + output projection
# one grid step = one batch, all heads; out_proj weight resident across steps
# ---------------------------------------------------------------------------
def _mhsa_outproj_kernel(qkv_ref, wo_ref, bo_ref, o_ref, *,
                         num_heads, head_dim, scale):
    inner = num_heads * head_dim
    qkv = qkv_ref[0]                                   # (L, 3*inner)

    heads = []
    for h in range(num_heads):                         # static, unrolled
        q = qkv[:, h * head_dim:(h + 1) * head_dim].astype(jnp.float32) * scale
        k = qkv[:, inner + h * head_dim:
                   inner + (h + 1) * head_dim].astype(jnp.float32)
        v = qkv[:, 2 * inner + h * head_dim:
                   2 * inner + (h + 1) * head_dim]
        s = jax.lax.dot_general(q, k, (((1,), (1,)), ((), ())),   # q @ k.T
                                preferred_element_type=jnp.float32)
        m = jnp.max(s, axis=-1, keepdims=True)
        p = jnp.exp(s - m)
        l = jnp.sum(p, axis=-1, keepdims=True)
        o = jnp.dot(p.astype(v.dtype), v, preferred_element_type=jnp.float32)
        heads.append(o * pl.reciprocal(l, approx=True))  # EUP slot

    merged = jnp.concatenate(heads, axis=-1)            # (L, inner) f32
    out = jnp.dot(merged.astype(wo_ref.dtype), wo_ref[...],
                  preferred_element_type=jnp.float32)
    out = out + bo_ref[...].astype(jnp.float32)
    o_ref[0] = out.astype(o_ref.dtype)                  # single lane-dense store


def multihead_sdpa_outproj(qkvp, wo_t, bo, *, batch, seq, num_heads, head_dim):
    """qkvp: (B*L, 3*inner) packed [q | k | v].  Per-head softmax attention,
    heads merged, then out_proj applied in-kernel.  Returns (B, L, inner)."""
    inner = num_heads * head_dim
    qkv3 = qkvp.reshape(batch, seq, 3 * inner)           # metadata-only reshape
    scale = 1.0 / math.sqrt(head_dim)
    return pl.pallas_call(
        partial(_mhsa_outproj_kernel, num_heads=num_heads, head_dim=head_dim,
                scale=scale),
        out_shape=jax.ShapeDtypeStruct((batch, seq, inner), qkvp.dtype),
        grid=(batch,),
        in_specs=[
            pl.BlockSpec((1, seq, 3 * inner), lambda b: (b, 0, 0)),
            pl.BlockSpec((inner, inner), lambda b: (0, 0)),   # resident weight
            pl.BlockSpec((1, inner), lambda b: (0, 0)),       # resident bias
        ],
        out_specs=pl.BlockSpec((1, seq, inner), lambda b: (b, 0, 0)),
        compiler_params=pltpu.CompilerParams(
            dimension_semantics=("parallel",)),
    )(qkv3, wo_t, bo)


# ---------------------------------------------------------------------------
# Forward pass
# ---------------------------------------------------------------------------
def attention_forward(x, params, *, num_heads, head_dim, dropout=0.0):
    assert dropout == 0.0, "dropout not implemented in the Pallas kernel"
    B, L, E = x.shape
    inner = num_heads * head_dim
    hi = jax.lax.Precision.HIGHEST

    # Fold to_qkv (bias-free) with MultiheadAttention's in_proj: one matmul.
    wq_in, wk_in, wv_in = jnp.split(params["in_proj_w"], 3, axis=0)  # (inner, inner)
    wq_x, wk_x, wv_x = jnp.split(params["w_qkv"], 3, axis=0)         # (inner, E)
    w_fused_t = jnp.concatenate(
        [jnp.matmul(wq_in, wq_x, precision=hi),
         jnp.matmul(wk_in, wk_x, precision=hi),
         jnp.matmul(wv_in, wv_x, precision=hi)], axis=0).T            # (E, 3*inner)
    b_fused = params["in_proj_b"].reshape(1, 3 * inner)

    x2d = x.reshape(B * L, E)
    qkvp = linear(x2d, w_fused_t, b_fused)                            # (B*L, 3*inner)

    out = multihead_sdpa_outproj(
        qkvp, params["out_w"].T, params["out_b"].reshape(1, inner),
        batch=B, seq=L, num_heads=num_heads, head_dim=head_dim)       # (B, L, inner)
    return out


# ---------------------------------------------------------------------------
# Pure-JAX reference (unfused, high precision) for validation
# ---------------------------------------------------------------------------
def attention_reference(x, params, *, num_heads, head_dim):
    B, L, E = x.shape
    inner = num_heads * head_dim
    hi = jax.lax.Precision.HIGHEST

    qkv = jnp.matmul(x, params["w_qkv"].T, precision=hi)
    q, k, v = jnp.split(qkv, 3, axis=-1)
    wq, wk, wv = jnp.split(params["in_proj_w"], 3, axis=0)
    bq, bk, bv = jnp.split(params["in_proj_b"], 3, axis=-1)
    qp = jnp.matmul(q, wq.T, precision=hi) + bq
    kp = jnp.matmul(k, wk.T, precision=hi) + bk
    vp = jnp.matmul(v, wv.T, precision=hi) + bv

    def to_heads(t):
        return t.reshape(B, L, num_heads, head_dim).transpose(0, 2, 1, 3)

    qh, kh, vh = to_heads(qp), to_heads(kp), to_heads(vp)
    s = jnp.einsum("bhqd,bhkd->bhqk", qh, kh, precision=hi) / math.sqrt(head_dim)
    p = jax.nn.softmax(s, axis=-1)
    o = jnp.einsum("bhqk,bhkd->bhqd", p, vh, precision=hi)
    o = o.transpose(0, 2, 1, 3).reshape(B, L, inner)
    return jnp.matmul(o, params["out_w"].T, precision=hi) + params["out_b"]


# ---------------------------------------------------------------------------
if __name__ == "__main__":
    B, L = 2, 8
    embed_dim = 32
    num_heads = 2
    head_dim = 8
    inner = num_heads * head_dim

    key = jax.random.PRNGKey(0)
    kx, k1, k2, k3, k4, k5 = jax.random.split(key, 6)

    x = jax.random.normal(kx, (B, L, embed_dim), jnp.float32)

    params = {
        # to_qkv weight: (3*inner, embed)  [PyTorch Linear layout]
        "w_qkv": jax.random.normal(k1, (3 * inner, embed_dim), jnp.float32) * 0.05,
        # MultiheadAttention in_proj_weight / in_proj_bias
        "in_proj_w": jax.random.normal(k2, (3 * inner, inner), jnp.float32) * 0.05,
        "in_proj_b": jax.random.normal(k3, (3 * inner,), jnp.float32) * 0.05,
        # out_proj
        "out_w": jax.random.normal(k4, (inner, inner), jnp.float32) * 0.05,
        "out_b": jax.random.normal(k5, (inner,), jnp.float32) * 0.05,
    }

    out = attention_forward(x, params, num_heads=num_heads, head_dim=head_dim)
    out = jax.block_until_ready(out)

    ref = attention_reference(x, params, num_heads=num_heads, head_dim=head_dim)
    assert out.shape == (B, L, inner)
    # Tolerance accounts for weight folding (different rounding order) and the
    # approximate EUP reciprocal used for the softmax normalization.
    assert jnp.allclose(out, ref, rtol=2e-3, atol=1e-3), "mismatch vs reference"

    print("KERNEL_OK")
</pallas_src>

<mosaic_0001>
module attributes {stable_mosaic.version = 11 : i64} {
  func.func @_linear_kernel(%arg0: i32, %arg1: i32, %arg2: i32, %arg3: memref<16x32xf32, #tpu.memory_space<vmem>>, %arg4: memref<32x48xf32, #tpu.memory_space<vmem>>, %arg5: memref<1x48xf32, #tpu.memory_space<vmem>>, %arg6: memref<16x48xf32, #tpu.memory_space<vmem>>, %arg7: memref<16x48xf32, #tpu.memory_space<vmem>>) attributes {dimension_semantics = [#tpu.dimension_semantics<parallel>, #tpu.dimension_semantics<parallel>, #tpu.dimension_semantics<arbitrary>], iteration_bounds = array<i64: 1, 1, 1>, scalar_prefetch = 0 : i64, scratch_operands = 1 : i64, tpu.core_type = #tpu.core_type<tc>, window_params = [{transform_indices = @transform_0, window_bounds = array<i64: 16, 32>}, {transform_indices = @transform_1, window_bounds = array<i64: 32, 48>}, {transform_indices = @transform_2, window_bounds = array<i64: 1, 48>}, {transform_indices = @transform_3, window_bounds = array<i64: 16, 48>}]} {
    %c0_i32 = arith.constant 0 : i32
    %0 = arith.cmpi eq, %arg2, %c0_i32 : i32
    %1 = arith.extui %0 : i1 to i32
    %c0_i32_0 = arith.constant 0 : i32
    %2 = arith.cmpi ne, %1, %c0_i32_0 : i32
    scf.if %2 {
      %cst_10 = arith.constant 0.000000e+00 : f32
      %12 = vector.broadcast %cst_10 : f32 to vector<16x48xf32>
      %c0_11 = arith.constant 0 : index
      %c0_12 = arith.constant 0 : index
      %13 = vector.load %arg7[%c0_11, %c0_12] : memref<16x48xf32, #tpu.memory_space<vmem>>, vector<16x48xf32>
      tpu.vector_store %arg7[%c0_11, %c0_12], %12 {strides = array<i32>} : memref<16x48xf32, #tpu.memory_space<vmem>>, vector<16x48xf32>,
    } else {
    }
    %c0 = arith.constant 0 : index
    %c0_1 = arith.constant 0 : index
    %3 = vector.load %arg7[%c0, %c0_1] : memref<16x48xf32, #tpu.memory_space<vmem>>, vector<16x48xf32>
    %c0_2 = arith.constant 0 : index
    %c0_3 = arith.constant 0 : index
    %4 = vector.load %arg3[%c0_2, %c0_3] : memref<16x32xf32, #tpu.memory_space<vmem>>, vector<16x32xf32>
    %c0_4 = arith.constant 0 : index
    %c0_5 = arith.constant 0 : index
    %5 = vector.load %arg4[%c0_4, %c0_5] : memref<32x48xf32, #tpu.memory_space<vmem>>, vector<32x48xf32>
    %cst = arith.constant dense<0.000000e+00> : vector<16x48xf32>
    %6 = tpu.matmul %4, %5, %cst {dimension_numbers = #tpu.dot_dimension_numbers<[1], [0], [0], [1], [0, 0, 1, 1], [], []>} : vector<16x32xf32>, vector<32x48xf32>, vector<16x48xf32> -> vector<16x48xf32>
    %7 = arith.addf %3, %6 : vector<16x48xf32>
    %c0_6 = arith.constant 0 : index
    %c0_7 = arith.constant 0 : index
    %8 = vector.load %arg7[%c0_6, %c0_7] : memref<16x48xf32, #tpu.memory_space<vmem>>, vector<16x48xf32>
    tpu.vector_store %arg7[%c0_6, %c0_7], %7 {strides = array<i32>} : memref<16x48xf32, #tpu.memory_space<vmem>>, vector<16x48xf32>,
    %c0_i32_8 = arith.constant 0 : i32
    %9 = arith.cmpi eq, %arg2, %c0_i32_8 : i32
    %10 = arith.extui %9 : i1 to i32
    %c0_i32_9 = arith.constant 0 : i32
    %11 = arith.cmpi ne, %10, %c0_i32_9 : i32
    scf.if %11 {
      %c0_10 = arith.constant 0 : index
      %c0_11 = arith.constant 0 : index
      %12 = vector.load %arg7[%c0_10, %c0_11] : memref<16x48xf32, #tpu.memory_space<vmem>>, vector<16x48xf32>
      %c0_12 = arith.constant 0 : index
      %c0_13 = arith.constant 0 : index
      %13 = vector.load %arg5[%c0_12, %c0_13] : memref<1x48xf32, #tpu.memory_space<vmem>>, vector<1x48xf32>
      %14 = vector.broadcast %13 : vector<1x48xf32> to vector<16x48xf32>
      %15 = arith.addf %12, %14 : vector<16x48xf32>
      %c0_14 = arith.constant 0 : index
      %c0_15 = arith.constant 0 : index
      %16 = vector.load %arg6[%c0_14, %c0_15] : memref<16x48xf32, #tpu.memory_space<vmem>>, vector<16x48xf32>
      tpu.vector_store %arg6[%c0_14, %c0_15], %15 {strides = array<i32>} : memref<16x48xf32, #tpu.memory_space<vmem>>, vector<16x48xf32>,
    } else {
    }
    return
  }
  func.func @transform_0(%arg0: i32, %arg1: i32, %arg2: i32) -> (i32, i32) {
    %c0_i32 = arith.constant 0 : i32
    return %arg0, %arg2 : i32, i32
  }
  func.func @transform_1(%arg0: i32, %arg1: i32, %arg2: i32) -> (i32, i32) {
    %c0_i32 = arith.constant 0 : i32
    return %arg2, %arg1 : i32, i32
  }
  func.func @transform_2(%arg0: i32, %arg1: i32, %arg2: i32) -> (i32, i32) {
    %c0_i32 = arith.constant 0 : i32
    %c0_i32_0 = arith.constant 0 : i32
    return %c0_i32, %arg1 : i32, i32
  }
  func.func @transform_3(%arg0: i32, %arg1: i32, %arg2: i32) -> (i32, i32) {
    %c0_i32 = arith.constant 0 : i32
    return %arg0, %arg1 : i32, i32
  }
}

</mosaic_0001>

<bundles_post_ra>
// kernel: tpu_custom_call.1
= control target key start
LH: loop header
LB: loop body
LE: loop exit
PB: predicated region body
PF: predicated region fallthrough
CT: control target
= control target key end

     0   :  { %8 = vsyncpa [#allocation4], 0  ;;  %s326_s0 = inlined_call_operand.hbm [shape: f32[16,32], index: 0, kind: input, shape index: {}]   ;;  %s327_s1 = inlined_call_operand.hbm [shape: f32[32,48], index: 1, kind: input, shape index: {}]   ;;  %s328_s2 = inlined_call_operand.vmem [shape: f32[1,48], index: 2, kind: input, shape index: {}]   ;;  %s329_s3 = inlined_call_operand.hbm [shape: f32[16,48], index: 3, kind: output, shape index: {}]  }
   0x1   :  { %9 = vsyncpa [#allocation7], 0 }
   0x2   :  { %10 = vsyncpa [#allocation5], 0  ;;  %s271_s12 = smov [#allocation3]  }
   0x3   :  { %s16_s13 = sshll.u32 %s271_s12, 4  ;;  %s17_s13 = int_to_ptr.vmem [resolvable:$true] %s16_s13 }
   0x4   :  { %s213_s14 = scalar_lea.vmem %s17_s13, 256  ;;  %p218_p1 = scmp.lt.s32.totalorder %s17_s13, %s17_s13 }
   0x5   :  { %p214_p0 = scmp.ne.s32.totalorder %s17_s13, %s213_s14  ;;  %p219_p2 = scmp.lt.s32.totalorder %s213_s14, %s213_s14 }
   0x7   :  { %p220_p3 = por %p219_p2, %p218_p1 }
   0x9   :  { %p221_p4 = pnand %p220_p3, %p214_p0 }
   0xb   :  { %224 = shalt.err (!%p221_p4)
}
   0xc   :  { %s272_s15 = smov 128   ;;  %s273_s16 = smov 8  }
   0xd   :  { %22 = dma.hbm_to_vmem [thread:$0]  %s326_s0, 256, %s17_s13, [#allocation4], %s272_s15, %s272_s15, %s273_s16  }
   0xe   :  { %s274_s19 = smov [#allocation6]  }
   0xf   :  { %s28_s20 = sshll.u32 %s274_s19, 4  ;;  %s29_s20 = int_to_ptr.vmem [resolvable:$true] %s28_s20 }
  0x10   :  { %s233_s21 = scalar_lea.vmem %s29_s20, 512  ;;  %p238_p6 = scmp.lt.s32.totalorder %s29_s20, %s29_s20 }
  0x11   :  { %p234_p5 = scmp.ne.s32.totalorder %s29_s20, %s233_s21  ;;  %p239_p7 = scmp.lt.s32.totalorder %s233_s21, %s233_s21 }
  0x13   :  { %p240_p8 = por %p239_p7, %p238_p6 }
  0x15   :  { %p241_p9 = pnand %p240_p8, %p234_p5 }
  0x17   :  { %244 = shalt.err (!%p241_p9)
}
  0x18   :  { %34 = dma.hbm_to_vmem [thread:$0]  %s327_s1, 512, %s29_s20, [#allocation7], %s272_s15, %s272_s15, %s273_s16  }
  0x19   :  { %265 = dma.done.wait [#allocation4], 256  }
  0x1a   :  { %266 = vsyncadd [#allocation4], 4294967040 }
  0x1b   :  { %267 = dma.done.wait [#allocation7], 512  }
  0x1c   :  { %268 = vsyncadd [#allocation7], 4294966784  ;;  %vm47_vm0 = vcmask 392192   ;;  %v275_v0 = vmov 0.0   ;;  %vm58_vm1 = vcmask 261120   ;;  %v57_v1 = vld [vmem:[#allocation6 + $0x18] sm:$0xff] }
  0x1d   :  { %49 = vst.msk [vmem:[#allocation2 + $0x8] sm:$0xff] %vm47_vm0, %v275_v0  ;;  %48 = vst.msk [vmem:[#allocation2] sm:$0xff] %vm47_vm0, %v275_v0  ;;  %v56_v2 = vld [vmem:[#allocation6 + $0x10] sm:$0xff]  ;;  %188 = vmatprep.subr.mxu0 %v57_v1  ;;  %v55_v4 = vld [vmem:[#allocation6 + $0x8] sm:$0xff]  ;;  %s276_s24 = smov [#allocation8]  }
  0x1e   :  { %v52_v3 = vld [vmem:[#allocation3] sm:$0xff]  ;;  %189 = vmatpush3.msra.mxu0 %v57_v1  ;;  %v54_v5 = vld [vmem:[#allocation6] sm:$0xff]  ;;  %v53_v6 = vld [vmem:[#allocation3 + $0x8] sm:$0xff]  ;;  %s166_s25 = sshll.u32 %s276_s24, 4  ;;  %s167_s25 = int_to_ptr.vmem [resolvable:$true] %s166_s25 }
  0x1f   :  { %196 = vmatprep.mubr.msk.f32.mxu0 %vm58_vm1, %v52_v3  ;;  %190 = vmatprep.subr.mxu0 %v56_v2  ;;  %v181_v13 = vld [vmem:[%s328_s2] ss:$0 sm:$0xff]  ;;  %s245_s26 = scalar_lea.vmem %s167_s25, 256  ;;  %p250_p11 = scmp.lt.s32.totalorder %s167_s25, %s167_s25 }
  0x20   :  { %191 = vmatpush3.msra.mxu0 %v56_v2  ;;  %p246_p10 = scmp.ne.s32.totalorder %s167_s25, %s245_s26  ;;  %p251_p12 = scmp.lt.s32.totalorder %s245_s26, %s245_s26 }
  0x21   :  { %192 = vmatprep.subr.mxu0 %v55_v4 }
  0x22   :  { %193 = vmatpush3.msra.mxu0 %v55_v4  ;;  %p252_p13 = por %p251_p12, %p250_p11 }
  0x23   :  { %194 = vmatprep.subr.mxu0 %v54_v5 }
  0x24   :  { %195 = vmatpush3.msra.mxu0 %v54_v5  ;;  %v51_v7 = vld [vmem:[#allocation2 + $0x8] sm:$0xff]  ;;  %v50_v9 = vld [vmem:[#allocation2] sm:$0xff]  ;;  %p253_p0 = pnand %p252_p13, %p246_p10 }
  0x25   :  { %197 = vmatmul.mubr.msk.f32.vlgmr.msra.gmra.mxu0 %vm58_vm1, %v53_v6 }
  0xe5   :  { %v198_v8 = vpop.f32.mrf.mxu0 }
  0xe6   :  { %v141_v10 = vadd.f32 %v198_v8, %v51_v7 }
  0xe7   :  { %v131_v11 = vpop.f32.mrf.mxu0 }
  0xe8   :  { %144 = vst.msk [vmem:[#allocation2 + $0x8] sm:$0xff] %vm47_vm0, %v141_v10  ;;  %v140_v12 = vadd.f32 %v131_v11, %v50_v9 }
  0xea   :  { %143 = vst.msk [vmem:[#allocation2] sm:$0xff] %vm47_vm0, %v140_v12 }
  0xef   :  { %v149_v14 = vld [vmem:[#allocation2 + $0x8] sm:$0xff] }
  0xf0   :  { %v158_v15 = vadd.f32 %v181_v13, %v149_v14 }
  0xf1   :  { %v148_v16 = vld [vmem:[#allocation2] sm:$0xff] }
  0xf2   :  { %v157_v17 = vadd.f32 %v181_v13, %v148_v16  ;;  %160 = vst.msk [vmem:[#allocation8 + $0x8] sm:$0xff] %vm47_vm0, %v158_v15 }
  0xf4   :  { %159 = vst.msk [vmem:[#allocation8] sm:$0xff] %vm47_vm0, %v157_v17 }
  0xf5   :  { %256 = shalt.err (!%p253_p0)
}
  0xf6   :  { %172 = dma.vmem_to_hbm [thread:$0]  %s167_s25, 256, %s329_s3, [#allocation5], %s272_s15, %s272_s15, %s273_s16  }
  0xf7   :  { %269 = dma.done.wait [#allocation5], 256  }
  0xf8   :  { %270 = vsyncadd [#allocation5], 4294967040 }
  0xf9   :  { %176 = vsyncpa [#allocation4], 1 }
  0xfa   :  { %177 = vsyncpa [#allocation7], 1 }
  0xfb   :  { %178 = vsyncpa [#allocation5], 1 }

</bundles_post_ra>
